<compile_context>
chip_gen: v5e
topology: v5e:2x2
jax: 0.10.0
libtpu: 0.0.40
codegen_flags: <defaults>
</compile_context>

<pallas_src>
import jax
import jax.numpy as jnp
from jax.experimental import pallas as pl
from jax.experimental.pallas import tpu as pltpu

NEG = -1e30            # finite stand-in for -inf inside the CTC DP
_TILE_ROWS = 2048      # detector pixel tile = 2048 x 128 (13 f32 planes ~ 13 MiB/step)
_DET_VMEM_LIMIT = 40 << 20


# ----------------------------------------------------------------------------
# Detector loss kernel: dice cls loss + IoU/angle geo loss.
# Grid = (batch, pixel_tiles). The (1,4,8,128) output block is VMEM-resident
# across the pixel-tile axis and accumulated with plain vreg adds; the final
# cross-lane reduction + normalization is done in the wrapper.
# ----------------------------------------------------------------------------
def _make_detector_kernel(valid_rows, needs_mask):
    def kernel(ytc_ref, ypc_ref, msk_ref, ytg_ref, ypg_ref, out_ref):
        p = pl.program_id(1)
        tr = ytc_ref.shape[1]

        @pl.when(p == 0)
        def _init():
            out_ref[...] = jnp.zeros_like(out_ref)

        ytc = ytc_ref[0].astype(jnp.float32)          # (tr, 128)
        ypc = ypc_ref[0].astype(jnp.float32)
        msk = msk_ref[0].astype(jnp.float32)
        w = ytc * msk                                  # y_true * mask, computed once

        # geometry channels: d1=top, d2=right, d3=bottom, d4=left, theta
        d1g = ytg_ref[0, 0].astype(jnp.float32)
        d2g = ytg_ref[0, 1].astype(jnp.float32)
        d3g = ytg_ref[0, 2].astype(jnp.float32)
        d4g = ytg_ref[0, 3].astype(jnp.float32)
        thg = ytg_ref[0, 4].astype(jnp.float32)
        d1p = ypg_ref[0, 0].astype(jnp.float32)
        d2p = ypg_ref[0, 1].astype(jnp.float32)
        d3p = ypg_ref[0, 2].astype(jnp.float32)
        d4p = ypg_ref[0, 3].astype(jnp.float32)
        thp = ypg_ref[0, 4].astype(jnp.float32)

        area_gt = (d1g + d3g) * (d2g + d4g)
        area_pr = (d1p + d3p) * (d2p + d4p)
        w_union = jnp.minimum(d2g, d2p) + jnp.minimum(d4g, d4p)
        h_union = jnp.minimum(d1g, d1p) + jnp.minimum(d3g, d3p)
        area_int = w_union * h_union
        area_uni = area_gt + area_pr - area_int
        # -log((i+1)/(u+1)) == log(u+1) - log(i+1)  (two EUP logs, no divide)
        l_aabb = jnp.log(area_uni + 1.0) - jnp.log(area_int + 1.0)
        l_theta = 1.0 - jnp.cos(thp - thg)
        l_g = l_aabb + 20.0 * l_theta

        t0 = w * ypc           # sum(y_true * y_pred * mask)
        t1 = w                 # sum(y_true * mask)
        t2 = ypc * msk         # sum(y_pred * mask)
        t3 = l_g * w           # sum(L_g * y_true * mask)

        if needs_mask:
            # ragged last pixel tile: zero out rows past the real extent
            row = p * tr + jax.lax.broadcasted_iota(jnp.int32, (tr, 128), 0)
            ok = row < valid_rows
            zero = jnp.float32(0.0)
            t0 = jnp.where(ok, t0, zero)
            t1 = jnp.where(ok, t1, zero)
            t2 = jnp.where(ok, t2, zero)
            t3 = jnp.where(ok, t3, zero)

        def plane(x):
            # (tr,128) -> (8,128): layout-preserving reshape + pure VPU vreg adds
            return jnp.sum(x.reshape(tr // 8, 8, 128), axis=0)

        out_ref[0, 0] += plane(t0)
        out_ref[0, 1] += plane(t1)
        out_ref[0, 2] += plane(t2)
        out_ref[0, 3] += plane(t3)

    return kernel


def detector_loss(y_true_cls, y_pred_cls, y_true_geo, y_pred_geo, training_masks):
    B, _, H, W = y_true_cls.shape
    P = H * W
    r_full = -(-P // 128)                  # rows of 128 lanes
    r8 = -(-r_full // 8) * 8               # rows padded to a sublane multiple
    if r8 <= _TILE_ROWS:
        tr, n_ptiles = r8, 1
    else:
        tr, n_ptiles = _TILE_ROWS, -(-r8 // _TILE_ROWS)
    ppad = r8 * 128
    needs_mask = (n_ptiles * tr != r8)     # grid raggedness handled in-kernel

    def prep1(x):                          # (B,1,H,W) -> (B, r8, 128)
        x = x.reshape(B, P)
        if ppad != P:
            x = jnp.pad(x, ((0, 0), (0, ppad - P)))
        return x.reshape(B, r8, 128)

    def prep5(x):                          # (B,5,H,W) -> (B, 5, r8, 128)
        x = x.reshape(B, 5, P)
        if ppad != P:
            x = jnp.pad(x, ((0, 0), (0, 0), (0, ppad - P)))
        return x.reshape(B, 5, r8, 128)

    parts = pl.pallas_call(
        _make_detector_kernel(r8, needs_mask),
        out_shape=jax.ShapeDtypeStruct((B, 4, 8, 128), jnp.float32),
        grid=(B, n_ptiles),
        in_specs=[
            pl.BlockSpec((1, tr, 128), lambda b, p: (b, p, 0)),
            pl.BlockSpec((1, tr, 128), lambda b, p: (b, p, 0)),
            pl.BlockSpec((1, tr, 128), lambda b, p: (b, p, 0)),
            pl.BlockSpec((1, 5, tr, 128), lambda b, p: (b, 0, p, 0)),
            pl.BlockSpec((1, 5, tr, 128), lambda b, p: (b, 0, p, 0)),
        ],
        out_specs=pl.BlockSpec((1, 4, 8, 128), lambda b, p: (b, 0, 0, 0)),
        compiler_params=pltpu.CompilerParams(
            dimension_semantics=("parallel", "arbitrary"),
            vmem_limit_bytes=_DET_VMEM_LIMIT),
    )(prep1(y_true_cls), prep1(y_pred_cls), prep1(training_masks),
      prep5(y_true_geo), prep5(y_pred_geo))

    sums = jnp.sum(parts, axis=(0, 2, 3))  # (4,) tiny reduction in XLA
    eps = jnp.float32(1e-5)
    dice = 1.0 - 2.0 * sums[0] / (sums[1] + sums[2] + eps)
    cls_loss = 0.01 * dice
    geo_loss = sums[3] / jnp.float32(B * H * W)
    return cls_loss, geo_loss


# ----------------------------------------------------------------------------
# Recognizer (CTC) loss kernel, tiled over the sample axis N.
# Per tile: batched log-softmax + one-hot gather matmul fill an
# (NT, Tpad, Spad) VMEM scratch; the alpha recursion consumes it in aligned
# 8-step chunks (8-step static unroll) with pltpu.roll providing the +1/+2
# shifts.  Per-tile partial sums are emitted to SMEM and summed in the wrapper.
# ----------------------------------------------------------------------------
def _make_ctc_kernel(n_real):
    def kernel(logits_ref, ext_ref, inlen_ref, tlen_ref, loss_ref, lp_ref):
        NT, Tpad, Cpad = logits_ref.shape
        Spad = ext_ref.shape[1]
        neg = jnp.float32(NEG)
        tile = pl.program_id(0)

        # ---- batched log-softmax over classes (padded classes are NEG) ----
        lg = logits_ref[...].astype(jnp.float32)                   # (NT, Tpad, Cpad)
        mx = jnp.max(lg, axis=-1, keepdims=True)
        logp = lg - (mx + jnp.log(jnp.sum(jnp.exp(lg - mx), axis=-1, keepdims=True)))

        # ---- gather log-probs of the extended labels via one-hot matmul ----
        # kept in f32: exact (one-hot is 0/1) and the matmul is off the serial path
        ext = ext_ref[...]                                         # (NT, Spad) int32
        c_iota = jax.lax.broadcasted_iota(jnp.int32, (NT, Cpad, Spad), 1)
        onehot = (c_iota == ext[:, None, :]).astype(jnp.float32)   # (NT, Cpad, Spad)
        lp_ref[...] = jax.lax.dot_general(
            logp, onehot,
            dimension_numbers=(((2,), (1,)), ((0,), (0,))),
            preferred_element_type=jnp.float32)                    # (NT, Tpad, Spad)

        # ---- extended-label masks (loop invariant) ----
        s_iota = jax.lax.broadcasted_iota(jnp.int32, (NT, Spad), 1)
        inlen = inlen_ref[...]                                     # (NT, 1) int32
        tlen = tlen_ref[...]                                       # (NT, 1) int32
        valid = s_iota < (2 * tlen + 1)
        is_label = (s_iota & 1) == 1
        ext_m2 = pltpu.roll(ext, shift=2, axis=1)
        skip = is_label & (s_iota >= 2) & (ext != ext_m2) & valid
        endpos = 2 * tlen
        end = (s_iota == endpos) | ((s_iota == endpos - 1) & (tlen > 0))

        def step(t, lp_t, alpha, final):
            a1 = jnp.where(s_iota >= 1, pltpu.roll(alpha, shift=1, axis=1), neg)
            a2 = jnp.where(skip, pltpu.roll(alpha, shift=2, axis=1), neg)
            m3 = jnp.maximum(jnp.maximum(alpha, a1), a2)
            lse3 = m3 + jnp.log(jnp.exp(alpha - m3) + jnp.exp(a1 - m3)
                                + jnp.exp(a2 - m3))
            alpha_new = jnp.where(valid, lse3 + lp_t, neg)
            final_new = jnp.where(inlen == (t + 1), alpha_new, final)
            return alpha_new, final_new

        # chunk 0 : t = 0 (init) then t = 1..7, statically unrolled
        lp_c0 = lp_ref[:, pl.ds(0, 8), :]                          # (NT, 8, Spad)
        lp0 = lp_c0[:, 0, :]
        alpha = jnp.where((s_iota <= 1) & valid, lp0, neg)
        final = jnp.where(inlen == 1, alpha, jnp.full_like(alpha, neg))
        for k in range(1, 8):
            alpha, final = step(k, lp_c0[:, k, :], alpha, final)

        # remaining time steps, 8 per chunk (one aligned slab load per chunk,
        # 8-step static unroll inside the serial recursion)
        def chunk(cb, carry):
            a, f = carry
            t0 = pl.multiple_of(cb * 8, 8)
            lp_c = lp_ref[:, pl.ds(t0, 8), :]                      # (NT, 8, Spad)
            for k in range(8):
                a, f = step(t0 + k, lp_c[:, k, :], a, f)
            return a, f

        alpha, final = jax.lax.fori_loop(1, Tpad // 8, chunk, (alpha, final))

        # ---- terminate: logsumexp over the two admissible end states ----
        fin = jnp.where(end, final, neg)
        fm = jnp.max(fin, axis=1, keepdims=True)                   # (NT, 1)
        loglik = fm + jnp.log(jnp.sum(jnp.exp(fin - fm), axis=1, keepdims=True))
        per = -loglik / jnp.maximum(tlen.astype(jnp.float32), 1.0)  # (NT, 1)

        # mask out padded samples of the (possibly ragged) last tile
        n_idx = tile * NT + jax.lax.broadcasted_iota(jnp.int32, (NT, 1), 0)
        per = jnp.where(n_idx < n_real, per, 0.0)
        loss_ref[0, 0] = jnp.sum(per)

    return kernel


def recognizer_loss(y_true_recog, y_pred_recog):
    targets, target_lengths = y_true_recog        # (N, Smax) int, (N,) int
    logits, input_lengths = y_pred_recog          # (T, N, C), (N,) int
    T, N, C = logits.shape
    Smax = targets.shape[1]

    S = 2 * Smax + 1
    Spad = -(-S // 128) * 128                     # lane-dense extended axis
    Cpad = -(-C // 128) * 128                     # lane-aligned class axis
    Tpad = -(-T // 8) * 8                         # sublane/chunk-aligned time axis
    NT = 8 if N <= 8 else 16                      # sample tile (register-pressure cap)
    n_tiles = -(-N // NT)
    Npad = n_tiles * NT

    # extended label sequence (blank-interleaved), padded to Spad
    pos = jnp.arange(Spad)
    is_label = (pos % 2) == 1
    lbl_idx = jnp.clip((pos - 1) // 2, 0, Smax - 1)
    ext = jnp.where(is_label[None, :], targets[:, lbl_idx], 0).astype(jnp.int32)
    ext = jnp.pad(ext, ((0, Npad - N), (0, 0)))

    # batch-first logits; pad with NEG so padded classes/steps never contribute
    logits_nt = jnp.transpose(logits, (1, 0, 2)).astype(jnp.float32)   # (N, T, C)
    logits_nt = jnp.pad(logits_nt,
                        ((0, Npad - N), (0, Tpad - T), (0, Cpad - C)),
                        constant_values=NEG)
    inlen = jnp.pad(input_lengths.astype(jnp.int32), (0, Npad - N)).reshape(Npad, 1)
    tlen = jnp.pad(target_lengths.astype(jnp.int32), (0, Npad - N)).reshape(Npad, 1)

    partial = pl.pallas_call(
        _make_ctc_kernel(N),
        out_shape=jax.ShapeDtypeStruct((n_tiles, 1), jnp.float32),
        grid=(n_tiles,),
        in_specs=[
            pl.BlockSpec((NT, Tpad, Cpad), lambda i: (i, 0, 0)),
            pl.BlockSpec((NT, Spad), lambda i: (i, 0)),
            pl.BlockSpec((NT, 1), lambda i: (i, 0)),
            pl.BlockSpec((NT, 1), lambda i: (i, 0)),
        ],
        out_specs=pl.BlockSpec((1, 1), lambda i: (i, 0),
                               memory_space=pltpu.MemorySpace.SMEM),
        scratch_shapes=[pltpu.VMEM((NT, Tpad, Spad), jnp.float32)],
        compiler_params=pltpu.CompilerParams(
            dimension_semantics=("parallel",)),
    )(logits_nt, ext, inlen, tlen)

    # nn.CTCLoss 'mean': per-sample loss / target_length, averaged over batch
    return jnp.sum(partial) / jnp.float32(N)


# ----------------------------------------------------------------------------
# FOTSLoss.forward equivalent
# ----------------------------------------------------------------------------
def fots_loss(y_true_cls, y_pred_cls, y_true_geo, y_pred_geo,
              y_true_recog, y_pred_recog, training_masks):
    # TODO(synk): config['model']['mode'] branching is ignored (the reference
    # forward shown always computes all three terms).
    cls_loss, geo_loss = detector_loss(y_true_cls, y_pred_cls,
                                       y_true_geo, y_pred_geo, training_masks)
    rec_loss = recognizer_loss(y_true_recog, y_pred_recog)
    return cls_loss, geo_loss, rec_loss


if __name__ == "__main__":
    key = jax.random.PRNGKey(0)
    ks = jax.random.split(key, 8)

    B, H, W = 2, 16, 16
    y_true_cls = (jax.random.uniform(ks[0], (B, 1, H, W)) > 0.5).astype(jnp.float32)
    y_pred_cls = jax.nn.sigmoid(jax.random.normal(ks[1], (B, 1, H, W)))
    y_true_geo = jnp.concatenate(
        [jax.random.uniform(ks[2], (B, 4, H, W), minval=1.0, maxval=10.0),
         jax.random.uniform(ks[2], (B, 1, H, W), minval=-0.4, maxval=0.4)], axis=1)
    y_pred_geo = jnp.concatenate(
        [jax.random.uniform(ks[3], (B, 4, H, W), minval=1.0, maxval=10.0),
         jax.random.uniform(ks[3], (B, 1, H, W), minval=-0.4, maxval=0.4)], axis=1)
    training_masks = (jax.random.uniform(ks[4], (B, 1, H, W)) > 0.2).astype(jnp.float32)

    T, N, C, Smax = 8, 2, 16, 4
    logits = jax.random.normal(ks[5], (T, N, C), dtype=jnp.float32)
    targets = jax.random.randint(ks[6], (N, Smax), 1, C, dtype=jnp.int32)
    target_lengths = jnp.array([4, 3], dtype=jnp.int32)
    input_lengths = jnp.array([T, T], dtype=jnp.int32)

    y_true_recog = (targets, target_lengths)
    y_pred_recog = (logits, input_lengths)

    out = fots_loss(y_true_cls, y_pred_cls, y_true_geo, y_pred_geo,
                    y_true_recog, y_pred_recog, training_masks)
    jax.block_until_ready(out)
    print("KERNEL_OK")
</pallas_src>

<mosaic_0001>
module attributes {stable_mosaic.version = 11 : i64} {
  func.func @kernel(%arg0: i32, %arg1: i32, %arg2: memref<1x8x128xf32, #tpu.memory_space<vmem>>, %arg3: memref<1x8x128xf32, #tpu.memory_space<vmem>>, %arg4: memref<1x8x128xf32, #tpu.memory_space<vmem>>, %arg5: memref<1x5x8x128xf32, #tpu.memory_space<vmem>>, %arg6: memref<1x5x8x128xf32, #tpu.memory_space<vmem>>, %arg7: memref<1x4x8x128xf32, #tpu.memory_space<vmem>>) attributes {dimension_semantics = [#tpu.dimension_semantics<parallel>, #tpu.dimension_semantics<arbitrary>], iteration_bounds = array<i64: 2, 1>, scalar_prefetch = 0 : i64, scratch_operands = 0 : i64, tpu.core_type = #tpu.core_type<tc>, window_params = [{transform_indices = @transform_0, window_bounds = array<i64: 1, 8, 128>}, {transform_indices = @transform_1, window_bounds = array<i64: 1, 8, 128>}, {transform_indices = @transform_2, window_bounds = array<i64: 1, 8, 128>}, {transform_indices = @transform_3, window_bounds = array<i64: 1, 5, 8, 128>}, {transform_indices = @transform_4, window_bounds = array<i64: 1, 5, 8, 128>}, {transform_indices = @transform_5, window_bounds = array<i64: 1, 4, 8, 128>}]} {
    %c0_i32 = arith.constant 0 : i32
    %0 = arith.cmpi eq, %arg1, %c0_i32 : i32
    %1 = arith.extui %0 : i1 to i32
    %c0_i32_0 = arith.constant 0 : i32
    %2 = arith.cmpi ne, %1, %c0_i32_0 : i32
    scf.if %2 {
      %cst_84 = arith.constant 0.000000e+00 : f32
      %94 = vector.broadcast %cst_84 : f32 to vector<1x4x8x128xf32>
      %c0_85 = arith.constant 0 : index
      %c0_86 = arith.constant 0 : index
      %c0_87 = arith.constant 0 : index
      %c0_88 = arith.constant 0 : index
      %95 = vector.load %arg7[%c0_85, %c0_86, %c0_87, %c0_88] : memref<1x4x8x128xf32, #tpu.memory_space<vmem>>, vector<1x4x8x128xf32>
      tpu.vector_store %arg7[%c0_85, %c0_86, %c0_87, %c0_88], %94 {strides = array<i32>} : memref<1x4x8x128xf32, #tpu.memory_space<vmem>>, vector<1x4x8x128xf32>,
    } else {
    }
    %c0 = arith.constant 0 : index
    %c0_1 = arith.constant 0 : index
    %c0_2 = arith.constant 0 : index
    %3 = vector.load %arg2[%c0, %c0_1, %c0_2] : memref<1x8x128xf32, #tpu.memory_space<vmem>>, vector<1x8x128xf32>
    %4 = vector.shape_cast %3 : vector<1x8x128xf32> to vector<8x128xf32>
    %c0_3 = arith.constant 0 : index
    %c0_4 = arith.constant 0 : index
    %c0_5 = arith.constant 0 : index
    %5 = vector.load %arg3[%c0_3, %c0_4, %c0_5] : memref<1x8x128xf32, #tpu.memory_space<vmem>>, vector<1x8x128xf32>
    %6 = vector.shape_cast %5 : vector<1x8x128xf32> to vector<8x128xf32>
    %c0_6 = arith.constant 0 : index
    %c0_7 = arith.constant 0 : index
    %c0_8 = arith.constant 0 : index
    %7 = vector.load %arg4[%c0_6, %c0_7, %c0_8] : memref<1x8x128xf32, #tpu.memory_space<vmem>>, vector<1x8x128xf32>
    %8 = vector.shape_cast %7 : vector<1x8x128xf32> to vector<8x128xf32>
    %9 = arith.mulf %4, %8 : vector<8x128xf32>
    %c0_9 = arith.constant 0 : index
    %c0_10 = arith.constant 0 : index
    %c0_11 = arith.constant 0 : index
    %c0_12 = arith.constant 0 : index
    %10 = vector.load %arg5[%c0_9, %c0_10, %c0_11, %c0_12] : memref<1x5x8x128xf32, #tpu.memory_space<vmem>>, vector<1x1x8x128xf32>
    %11 = vector.shape_cast %10 : vector<1x1x8x128xf32> to vector<8x128xf32>
    %c0_13 = arith.constant 0 : index
    %c1 = arith.constant 1 : index
    %c0_14 = arith.constant 0 : index
    %c0_15 = arith.constant 0 : index
    %12 = vector.load %arg5[%c0_13, %c1, %c0_14, %c0_15] : memref<1x5x8x128xf32, #tpu.memory_space<vmem>>, vector<1x1x8x128xf32>
    %13 = vector.shape_cast %12 : vector<1x1x8x128xf32> to vector<8x128xf32>
    %c0_16 = arith.constant 0 : index
    %c2 = arith.constant 2 : index
    %c0_17 = arith.constant 0 : index
    %c0_18 = arith.constant 0 : index
    %14 = vector.load %arg5[%c0_16, %c2, %c0_17, %c0_18] : memref<1x5x8x128xf32, #tpu.memory_space<vmem>>, vector<1x1x8x128xf32>
    %15 = vector.shape_cast %14 : vector<1x1x8x128xf32> to vector<8x128xf32>
    %c0_19 = arith.constant 0 : index
    %c3 = arith.constant 3 : index
    %c0_20 = arith.constant 0 : index
    %c0_21 = arith.constant 0 : index
    %16 = vector.load %arg5[%c0_19, %c3, %c0_20, %c0_21] : memref<1x5x8x128xf32, #tpu.memory_space<vmem>>, vector<1x1x8x128xf32>
    %17 = vector.shape_cast %16 : vector<1x1x8x128xf32> to vector<8x128xf32>
    %c0_22 = arith.constant 0 : index
    %c4 = arith.constant 4 : index
    %c0_23 = arith.constant 0 : index
    %c0_24 = arith.constant 0 : index
    %18 = vector.load %arg5[%c0_22, %c4, %c0_23, %c0_24] : memref<1x5x8x128xf32, #tpu.memory_space<vmem>>, vector<1x1x8x128xf32>
    %19 = vector.shape_cast %18 : vector<1x1x8x128xf32> to vector<8x128xf32>
    %c0_25 = arith.constant 0 : index
    %c0_26 = arith.constant 0 : index
    %c0_27 = arith.constant 0 : index
    %c0_28 = arith.constant 0 : index
    %20 = vector.load %arg6[%c0_25, %c0_26, %c0_27, %c0_28] : memref<1x5x8x128xf32, #tpu.memory_space<vmem>>, vector<1x1x8x128xf32>
    %21 = vector.shape_cast %20 : vector<1x1x8x128xf32> to vector<8x128xf32>
    %c0_29 = arith.constant 0 : index
    %c1_30 = arith.constant 1 : index
    %c0_31 = arith.constant 0 : index
    %c0_32 = arith.constant 0 : index
    %22 = vector.load %arg6[%c0_29, %c1_30, %c0_31, %c0_32] : memref<1x5x8x128xf32, #tpu.memory_space<vmem>>, vector<1x1x8x128xf32>
    %23 = vector.shape_cast %22 : vector<1x1x8x128xf32> to vector<8x128xf32>
    %c0_33 = arith.constant 0 : index
    %c2_34 = arith.constant 2 : index
    %c0_35 = arith.constant 0 : index
    %c0_36 = arith.constant 0 : index
    %24 = vector.load %arg6[%c0_33, %c2_34, %c0_35, %c0_36] : memref<1x5x8x128xf32, #tpu.memory_space<vmem>>, vector<1x1x8x128xf32>
    %25 = vector.shape_cast %24 : vector<1x1x8x128xf32> to vector<8x128xf32>
    %c0_37 = arith.constant 0 : index
    %c3_38 = arith.constant 3 : index
    %c0_39 = arith.constant 0 : index
    %c0_40 = arith.constant 0 : index
    %26 = vector.load %arg6[%c0_37, %c3_38, %c0_39, %c0_40] : memref<1x5x8x128xf32, #tpu.memory_space<vmem>>, vector<1x1x8x128xf32>
    %27 = vector.shape_cast %26 : vector<1x1x8x128xf32> to vector<8x128xf32>
    %c0_41 = arith.constant 0 : index
    %c4_42 = arith.constant 4 : index
    %c0_43 = arith.constant 0 : index
    %c0_44 = arith.constant 0 : index
    %28 = vector.load %arg6[%c0_41, %c4_42, %c0_43, %c0_44] : memref<1x5x8x128xf32, #tpu.memory_space<vmem>>, vector<1x1x8x128xf32>
    %29 = vector.shape_cast %28 : vector<1x1x8x128xf32> to vector<8x128xf32>
    %30 = arith.addf %11, %15 : vector<8x128xf32>
    %31 = arith.addf %13, %17 : vector<8x128xf32>
    %32 = arith.mulf %30, %31 : vector<8x128xf32>
    %33 = arith.addf %21, %25 : vector<8x128xf32>
    %34 = arith.addf %23, %27 : vector<8x128xf32>
    %35 = arith.mulf %33, %34 : vector<8x128xf32>
    %36 = arith.minimumf %13, %23 : vector<8x128xf32>
    %37 = arith.minimumf %17, %27 : vector<8x128xf32>
    %38 = arith.addf %36, %37 : vector<8x128xf32>
    %39 = arith.minimumf %11, %21 : vector<8x128xf32>
    %40 = arith.minimumf %15, %25 : vector<8x128xf32>
    %41 = arith.addf %39, %40 : vector<8x128xf32>
    %42 = arith.mulf %38, %41 : vector<8x128xf32>
    %43 = arith.addf %32, %35 : vector<8x128xf32>
    %44 = arith.subf %43, %42 : vector<8x128xf32>
    %cst = arith.constant 1.000000e+00 : f32
    %45 = vector.broadcast %cst : f32 to vector<8x128xf32>
    %46 = arith.addf %44, %45 : vector<8x128xf32>
    %47 = math.log %46 : vector<8x128xf32>
    %cst_45 = arith.constant 1.000000e+00 : f32
    %48 = vector.broadcast %cst_45 : f32 to vector<8x128xf32>
    %49 = arith.addf %42, %48 : vector<8x128xf32>
    %50 = math.log %49 : vector<8x128xf32>
    %51 = arith.subf %47, %50 : vector<8x128xf32>
    %52 = arith.subf %29, %19 : vector<8x128xf32>
    %53 = math.cos %52 : vector<8x128xf32>
    %cst_46 = arith.constant 1.000000e+00 : f32
    %54 = vector.broadcast %cst_46 : f32 to vector<8x128xf32>
    %55 = arith.subf %54, %53 : vector<8x128xf32>
    %cst_47 = arith.constant 2.000000e+01 : f32
    %56 = vector.broadcast %cst_47 : f32 to vector<8x128xf32>
    %57 = arith.mulf %56, %55 : vector<8x128xf32>
    %58 = arith.addf %51, %57 : vector<8x128xf32>
    %59 = arith.mulf %9, %6 : vector<8x128xf32>
    %60 = arith.mulf %6, %8 : vector<8x128xf32>
    %61 = arith.mulf %58, %9 : vector<8x128xf32>
    %c0_48 = arith.constant 0 : index
    %c0_49 = arith.constant 0 : index
    %c0_50 = arith.constant 0 : index
    %c0_51 = arith.constant 0 : index
    %62 = vector.load %arg7[%c0_48, %c0_49, %c0_50, %c0_51] : memref<1x4x8x128xf32, #tpu.memory_space<vmem>>, vector<1x1x8x128xf32>
    %63 = vector.shape_cast %62 : vector<1x1x8x128xf32> to vector<8x128xf32>
    %64 = vector.shape_cast %59 : vector<8x128xf32> to vector<1x8x128xf32>
    %cst_52 = arith.constant dense<0.000000e+00> : vector<8x128xf32>
    %65 = vector.multi_reduction <add>, %64, %cst_52 [0] : vector<1x8x128xf32> to vector<8x128xf32>
    %66 = arith.addf %63, %65 : vector<8x128xf32>
    %c0_53 = arith.constant 0 : index
    %c0_54 = arith.constant 0 : index
    %c0_55 = arith.constant 0 : index
    %c0_56 = arith.constant 0 : index
    %67 = vector.load %arg7[%c0_53, %c0_54, %c0_55, %c0_56] : memref<1x4x8x128xf32, #tpu.memory_space<vmem>>, vector<1x1x8x128xf32>
    %68 = vector.shape_cast %67 : vector<1x1x8x128xf32> to vector<8x128xf32>
    %69 = vector.shape_cast %66 : vector<8x128xf32> to vector<1x1x8x128xf32>
    tpu.vector_store %arg7[%c0_53, %c0_54, %c0_55, %c0_56], %69 {strides = array<i32>} : memref<1x4x8x128xf32, #tpu.memory_space<vmem>>, vector<1x1x8x128xf32>,
    %c0_57 = arith.constant 0 : index
    %c1_58 = arith.constant 1 : index
    %c0_59 = arith.constant 0 : index
    %c0_60 = arith.constant 0 : index
    %70 = vector.load %arg7[%c0_57, %c1_58, %c0_59, %c0_60] : memref<1x4x8x128xf32, #tpu.memory_space<vmem>>, vector<1x1x8x128xf32>
    %71 = vector.shape_cast %70 : vector<1x1x8x128xf32> to vector<8x128xf32>
    %72 = vector.shape_cast %9 : vector<8x128xf32> to vector<1x8x128xf32>
    %cst_61 = arith.constant dense<0.000000e+00> : vector<8x128xf32>
    %73 = vector.multi_reduction <add>, %72, %cst_61 [0] : vector<1x8x128xf32> to vector<8x128xf32>
    %74 = arith.addf %71, %73 : vector<8x128xf32>
    %c0_62 = arith.constant 0 : index
    %c1_63 = arith.constant 1 : index
    %c0_64 = arith.constant 0 : index
    %c0_65 = arith.constant 0 : index
    %75 = vector.load %arg7[%c0_62, %c1_63, %c0_64, %c0_65] : memref<1x4x8x128xf32, #tpu.memory_space<vmem>>, vector<1x1x8x128xf32>
    %76 = vector.shape_cast %75 : vector<1x1x8x128xf32> to vector<8x128xf32>
    %77 = vector.shape_cast %74 : vector<8x128xf32> to vector<1x1x8x128xf32>
    tpu.vector_store %arg7[%c0_62, %c1_63, %c0_64, %c0_65], %77 {strides = array<i32>} : memref<1x4x8x128xf32, #tpu.memory_space<vmem>>, vector<1x1x8x128xf32>,
    %c0_66 = arith.constant 0 : index
    %c2_67 = arith.constant 2 : index
    %c0_68 = arith.constant 0 : index
    %c0_69 = arith.constant 0 : index
    %78 = vector.load %arg7[%c0_66, %c2_67, %c0_68, %c0_69] : memref<1x4x8x128xf32, #tpu.memory_space<vmem>>, vector<1x1x8x128xf32>
    %79 = vector.shape_cast %78 : vector<1x1x8x128xf32> to vector<8x128xf32>
    %80 = vector.shape_cast %60 : vector<8x128xf32> to vector<1x8x128xf32>
    %cst_70 = arith.constant dense<0.000000e+00> : vector<8x128xf32>
    %81 = vector.multi_reduction <add>, %80, %cst_70 [0] : vector<1x8x128xf32> to vector<8x128xf32>
    %82 = arith.addf %79, %81 : vector<8x128xf32>
    %c0_71 = arith.constant 0 : index
    %c2_72 = arith.constant 2 : index
    %c0_73 = arith.constant 0 : index
    %c0_74 = arith.constant 0 : index
    %83 = vector.load %arg7[%c0_71, %c2_72, %c0_73, %c0_74] : memref<1x4x8x128xf32, #tpu.memory_space<vmem>>, vector<1x1x8x128xf32>
    %84 = vector.shape_cast %83 : vector<1x1x8x128xf32> to vector<8x128xf32>
    %85 = vector.shape_cast %82 : vector<8x128xf32> to vector<1x1x8x128xf32>
    tpu.vector_store %arg7[%c0_71, %c2_72, %c0_73, %c0_74], %85 {strides = array<i32>} : memref<1x4x8x128xf32, #tpu.memory_space<vmem>>, vector<1x1x8x128xf32>,
    %c0_75 = arith.constant 0 : index
    %c3_76 = arith.constant 3 : index
    %c0_77 = arith.constant 0 : index
    %c0_78 = arith.constant 0 : index
    %86 = vector.load %arg7[%c0_75, %c3_76, %c0_77, %c0_78] : memref<1x4x8x128xf32, #tpu.memory_space<vmem>>, vector<1x1x8x128xf32>
    %87 = vector.shape_cast %86 : vector<1x1x8x128xf32> to vector<8x128xf32>
    %88 = vector.shape_cast %61 : vector<8x128xf32> to vector<1x8x128xf32>
    %cst_79 = arith.constant dense<0.000000e+00> : vector<8x128xf32>
    %89 = vector.multi_reduction <add>, %88, %cst_79 [0] : vector<1x8x128xf32> to vector<8x128xf32>
    %90 = arith.addf %87, %89 : vector<8x128xf32>
    %c0_80 = arith.constant 0 : index
    %c3_81 = arith.constant 3 : index
    %c0_82 = arith.constant 0 : index
    %c0_83 = arith.constant 0 : index
    %91 = vector.load %arg7[%c0_80, %c3_81, %c0_82, %c0_83] : memref<1x4x8x128xf32, #tpu.memory_space<vmem>>, vector<1x1x8x128xf32>
    %92 = vector.shape_cast %91 : vector<1x1x8x128xf32> to vector<8x128xf32>
    %93 = vector.shape_cast %90 : vector<8x128xf32> to vector<1x1x8x128xf32>
    tpu.vector_store %arg7[%c0_80, %c3_81, %c0_82, %c0_83], %93 {strides = array<i32>} : memref<1x4x8x128xf32, #tpu.memory_space<vmem>>, vector<1x1x8x128xf32>,
    return
  }
  func.func @transform_0(%arg0: i32, %arg1: i32) -> (i32, i32, i32) {
    %c0_i32 = arith.constant 0 : i32
    %c0_i32_0 = arith.constant 0 : i32
    return %arg0, %arg1, %c0_i32 : i32, i32, i32
  }
  func.func @transform_1(%arg0: i32, %arg1: i32) -> (i32, i32, i32) {
    %c0_i32 = arith.constant 0 : i32
    %c0_i32_0 = arith.constant 0 : i32
    return %arg0, %arg1, %c0_i32 : i32, i32, i32
  }
  func.func @transform_2(%arg0: i32, %arg1: i32) -> (i32, i32, i32) {
    %c0_i32 = arith.constant 0 : i32
    %c0_i32_0 = arith.constant 0 : i32
    return %arg0, %arg1, %c0_i32 : i32, i32, i32
  }
  func.func @transform_3(%arg0: i32, %arg1: i32) -> (i32, i32, i32, i32) {
    %c0_i32 = arith.constant 0 : i32
    %c0_i32_0 = arith.constant 0 : i32
    %c0_i32_1 = arith.constant 0 : i32
    return %arg0, %c0_i32, %arg1, %c0_i32_0 : i32, i32, i32, i32
  }
  func.func @transform_4(%arg0: i32, %arg1: i32) -> (i32, i32, i32, i32) {
    %c0_i32 = arith.constant 0 : i32
    %c0_i32_0 = arith.constant 0 : i32
    %c0_i32_1 = arith.constant 0 : i32
    return %arg0, %c0_i32, %arg1, %c0_i32_0 : i32, i32, i32, i32
  }
  func.func @transform_5(%arg0: i32, %arg1: i32) -> (i32, i32, i32, i32) {
    %c0_i32 = arith.constant 0 : i32
    %c0_i32_0 = arith.constant 0 : i32
    %c0_i32_1 = arith.constant 0 : i32
    %c0_i32_2 = arith.constant 0 : i32
    return %arg0, %c0_i32, %c0_i32_0, %c0_i32_1 : i32, i32, i32, i32
  }
}

</mosaic_0001>

<bundles_post_ra>
// kernel: tpu_custom_call.1
= control target key start
LH: loop header
LB: loop body
LE: loop exit
PB: predicated region body
PF: predicated region fallthrough
CT: control target
= control target key end

     0   :  { %s1549_s0 = inlined_call_operand.hbm [shape: f32[2,8,128], index: 0, kind: input, shape index: {}]   ;;  %s1550_s1 = inlined_call_operand.hbm [shape: f32[2,8,128], index: 1, kind: input, shape index: {}]   ;;  %s1551_s2 = inlined_call_operand.hbm [shape: f32[2,8,128], index: 2, kind: input, shape index: {}]   ;;  %s1552_s3 = inlined_call_operand.hbm [shape: f32[2,5,8,128], index: 3, kind: input, shape index: {}]   ;;  %s1553_s4 = inlined_call_operand.hbm [shape: f32[2,5,8,128], index: 4, kind: input, shape index: {}]   ;;  %s1554_s5 = inlined_call_operand.hbm [shape: f32[2,4,8,128], index: 5, kind: output, shape index: {}]  }
   0x1   :  { %1566 = sst [smem:[#allocation25_spill]] %s1549_s0 }
   0x2   :  { %1567 = sst [smem:[#allocation26_spill]] %s1550_s1 }
   0x3   :  { %1568 = sst [smem:[#allocation27_spill]] %s1552_s3 }
   0x4   :  { %1569 = sst [smem:[#allocation28_spill]] %s1554_s5 }
   0x5   :  { %10 = vsyncpa [#allocation3], 0 }
   0x6   :  { %12 = vsyncpa [#allocation3 + $0x1], 0 }
   0x7   :  { %13 = vsyncpa [#allocation6], 0 }
   0x8   :  { %15 = vsyncpa [#allocation6 + $0x1], 0 }
   0x9   :  { %16 = vsyncpa [#allocation9], 0 }
   0xa   :  { %18 = vsyncpa [#allocation9 + $0x1], 0 }
   0xb   :  { %19 = vsyncpa [#allocation4], 0 }
   0xc   :  { %21 = vsyncpa [#allocation4 + $0x1], 0  ;;  %s1273_s18 = smov 0   ;;  %s1275_s19 = smov 0  }
   0xd   :  { %s1277_s20 = smov 0   ;;  %s1279_s21 = smov 0  }
   0xe   :  { %s1281_s22 = smov 0   ;;  %s1283_s23 = smov 0  }
   0xf LB: > { %1570 = sst [smem:[#allocation16_spill]] %s1210_s18  ;;  %s1304_s24 = sadd.s32 4294967295, %s1230_s23   ;;  %s1230_s23 = sphi %s1283_s23, %s27_s23   ;;  %s1226_s22 = sphi %s1281_s22, %s1600_s22   ;;  %s1222_s21 = sphi %s1279_s21, %s1599_s21   ;;  %s1218_s20 = sphi %s1277_s20, %s1598_s20   ;;  %s1214_s19 = sphi %s1275_s19, %s1602_s19   ;;  %s1210_s18 = sphi %s1273_s18, %s1601_s18  }
  0x10   : > { %1571 = sst [smem:[#allocation17_spill]] %s1218_s20  ;;  %s848_s25 = sadd.s32 4294967294, %s1230_s23  }
  0x11   : > { %1572 = sst [smem:[#allocation18_spill]] %s1222_s21  ;;  %s39_s26 = sadd.s32 1, %s1226_s22 }
  0x12   : > { %1573 = sst [smem:[#allocation19_spill]] %s1226_s22  ;;  %s48_s27 = sadd.s32 1, %s1218_s20 }
  0x13   : > { %1574 = sst [smem:[#allocation20_spill]] %s1230_s23  ;;  %p41_p0 = scmp.ge.s32.totalorder %s39_s26, 2 }
  0x14   : > { %p55_p1 = scmp.ne.s32.totalorder %s1218_s20, %s1214_s19  ;;  %p56_p2 = scmp.eq.s32.totalorder %s1230_s23, 0 }
  0x15   : > { %p61_p3 = scmp.ne.s32.totalorder %s1214_s19, %s1210_s18  ;;  %s1604_s26 = smov (%p41_p0, %s39_s26), 0 }
  0x16   : > { %1575 = sst [smem:[#allocation21_spill]] %s1604_s26  ;;  %p1316_p4 = por %p56_p2, %p55_p1 }
  0x17   : > { %p62_p5 = scmp.eq.s32.totalorder %s1304_s24, 0  ;;  %s43_s29 = ssub.s32 %s1226_s22, %s1604_s26 }
  0x18   : > { %p197_p6 = scmp.eq.s32.totalorder %s1304_s24, 1  ;;  %p46_p7 = scmp.eq.s32.totalorder %s43_s29, 0 }
  0x19   : > { %p1324_p8 = por %p62_p5, %p61_p3  ;;  %p203_p10 = scmp.eq.s32.totalorder %s848_s25, 1 }
  0x1a   : > { %p1328_p9 = por %p197_p6, %p55_p1  ;;  %p850_p12 = scmp.ge.s32.totalorder %s1230_s23, 2 }
  0x1b   : > { %s1333_s7 = scalar_select %p46_p7, %s1218_s20, %s48_s27  }
  0x1c   : > { %s1578_s6 = scalar_select %p1328_p9, 1, 0 }
  0x1d   : > { %1580 = sst [smem:[#allocation23_spill]] %s1333_s7  ;;  %p1335_p11 = por %p203_p10, %p61_p3 }
  0x1e   : > { %1579 = sst [smem:[#allocation22_spill]] %s1578_s6  ;;  %p924_p13 = scmp.lt.s32.totalorder %s1230_s23, 2 }
  0x1f   : > { %s1581_s8 = scalar_select %p1335_p11, 1, 0 }
  0x20   : > { %s1342_s9 = sand.u32 1, %s1218_s20   ;;  %s1348_s11 = sshll.u32 %s1226_s22, 3 }
  0x21   : > { %1582 = sst [smem:[#allocation24_spill]] %s1581_s8  ;;  %s1345_s10 = sshll.u32 %s1342_s9, 3 }
  0x22   : > { %p1352_p0 = pnand %p924_p13, %p1316_p4  ;;  %s243_s13 = sand.u32 1, %s1230_s23  }
  0x23   : > { %s1584_s1 = sld [smem:[#allocation26_spill]]  ;;  %s247_s25 = scalar_lea.vmem [#allocation5], %s1345_s10 }
  0x24   : > { %s256_s27 = sshll.u32 %s247_s25, 4  ;;  %s1362_s29 = scalar_lea.sflag [#allocation6], %s243_s13  ;;  %s257_s27 = int_to_ptr.vmem [resolvable:$true] %s256_s27 }
  0x25   : > { %s1558_s28 = smul.u32 40, %s1342_s9  ;;  %p859_p1 = scmp.ge.s32.totalorder %s1230_s23, 1 }
  0x26   : > { %p327_p2 = scmp.lt.s32.totalorder %s1230_s23, 3  ;;  %s888_s26 = smul.u32 40, %s1226_s22 }
  0x27   : > { %s287_s15 = scalar_lea.vmem [#allocation8], %s1558_s28  ;;  %s1586_s3 = sld [smem:[#allocation27_spill]] }
  0x28   : > { %p1371_p3 = pnand %p859_p1, %p327_p2  ;;  %s1232_s22 = smov 128  }
  0x29   : > { %s252_s16 = scalar_lea.hbm %s1584_s1, %s1348_s11  ;;  %s1233_s20 = smov 8  }
  0x2a   : > { %s254_s17 = sshll.u32 %s252_s16, 4  ;;  %s296_s16 = sshll.u32 %s287_s15, 4  ;;  %s255_s17 = int_to_ptr.hbm [resolvable:$true] %s254_s17  ;;  %s297_s16 = int_to_ptr.vmem [resolvable:$true] %s296_s16 }
  0x2b   : > { %910 = dma.hbm_to_vmem [thread:$0]  (!%p1352_p0), %s255_s17, 128, %s257_s27, %s1362_s29  }
  0x2c   : > { %s1380_s27 = scalar_lea.sflag [#allocation9], %s243_s13  ;;  %s1587_s0 = sld [smem:[#allocation25_spill]] }
  0x2d   : > { %s293_s7 = scalar_lea.hbm %s1586_s3, %s888_s26  ;;  %s227_s25 = scalar_lea.vmem [#allocation2], %s1345_s10 }
  0x2e   : > { %s294_s17 = sshll.u32 %s293_s7, 4  ;;  %s236_s3 = sshll.u32 %s227_s25, 4  ;;  %s295_s17 = int_to_ptr.hbm [resolvable:$true] %s294_s17  ;;  %s237_s3 = int_to_ptr.vmem [resolvable:$true] %s236_s3 }
  0x2f   : > { %916 = dma.hbm_to_vmem [thread:$0]  (!%p1352_p0), %s295_s17, 640, %s297_s16, %s1380_s27, %s1232_s22, %s1232_s22, %s1233_s20  }
  0x30   : > { %s224_s7 = scalar_lea.sflag [#allocation3], %s1342_s9  ;;  %s272_s18 = scalar_lea.hbm %s1551_s2, %s1348_s11 }
  0x31   : > { %s267_s16 = scalar_lea.vmem [#allocation7], %s1345_s10  ;;  %s274_s5 = sshll.u32 %s272_s18, 4  ;;  %s275_s5 = int_to_ptr.hbm [resolvable:$true] %s274_s5 }
  0x32   : > { %s232_s1 = scalar_lea.hbm %s1587_s0, %s1348_s11  ;;  %s276_s17 = sshll.u32 %s267_s16, 4  ;;  %s277_s17 = int_to_ptr.vmem [resolvable:$true] %s276_s17 }
  0x33   : > { %s234_s23 = sshll.u32 %s232_s1, 4  ;;  %s316_s1 = scalar_lea.hbm %s1553_s4, %s888_s26  ;;  %s235_s23 = int_to_ptr.hbm [resolvable:$true] %s234_s23 }
  0x34   : > { %907 = dma.hbm_to_vmem [thread:$0]  (!%p1352_p0), %s235_s23, 128, %s237_s3, %s224_s7  }
  0x35   : > { %913 = dma.hbm_to_vmem [thread:$0]  (!%p1352_p0), %s275_s5, 128, %s277_s17, %s1362_s29  }
  0x36   : > { %s1588_s25 = smul.u32 40, %s1342_s9  ;;  %s317_s21 = sshll.u32 %s316_s1, 4  ;;  %s318_s21 = int_to_ptr.hbm [resolvable:$true] %s317_s21 }
  0x37   : > { %331 = sbr.rel (%p1371_p3) target bundleno = 181 (0xb5), region = 40  ;;  %s1412_s3 = sand.u32 (!%p1371_p3), 1, %s1214_s19  }
  0x38   : > { %s310_s0 = scalar_lea.vmem [#allocation10], %s1588_s25  ;;  %s860_s5 = sshll.u32 (!%p1371_p3), %s1412_s3, 3 }
  0x39   : > { %s319_s6 = sshll.u32 %s310_s0, 4  ;;  %s334_s18 = scalar_lea.sflag (!%p1371_p3), [#allocation3], %s1412_s3  ;;  %s320_s6 = int_to_ptr.vmem [resolvable:$true] %s319_s6 }
  0x3a   : > { %919 = dma.hbm_to_vmem [thread:$0]  (!%p1352_p0), %s318_s21, 640, %s320_s6, %s1380_s27, %s1232_s22, %s1232_s22, %s1233_s20  }
  0x3b   : > { %s337_s23 = scalar_lea.vmem (!%p1371_p3), [#allocation2], %s860_s5 }
  0x3c   : > { %1193 = dma.done.wait (%p1324_p8), %s334_s18, 128  }
  0x3d   : > { %1195 = vsyncadd (%p1324_p8), %s334_s18, 4294967168  ;;  %s343_s0 = sand.u32 1, %s1304_s24   ;;  %s347_s21 = scalar_lea.vmem [#allocation5], %s860_s5 }
  0x3e   : > { %s344_s20 = scalar_lea.sflag [#allocation6], %s343_s0 }
  0x3f   : > { %1197 = dma.done.wait (%p1324_p8), %s344_s20, 256  }
  0x40   : > { %1199 = vsyncadd (%p1324_p8), %s344_s20, 4294967040  ;;  %s891_s22 = smul.u32 40, %s1412_s3  ;;  %s357_s26 = scalar_lea.vmem [#allocation7], %s860_s5 }
  0x41   : > { %s364_s6 = scalar_lea.sflag [#allocation9], %s343_s0 }
  0x42   : > { %s1426_s8 = scalar_lea.vmem [#allocation8], %s891_s22 }
  0x43   : > { %1201 = dma.done.wait (%p1324_p8), %s364_s6, 1280  }
  0x44   : > { %1203 = vsyncadd (%p1324_p8), %s364_s6, 4294966016  ;;  %s863_s24 = sshll.u32 %s1412_s3, 5  ;;  %v433_v0 = vld [vmem:[%s337_s23] sm:$0xff]  ;;  %v434_v1 = vld [vmem:[%s347_s21] sm:$0xff]  ;;  %s1437_s9 = scalar_lea.vmem [#allocation10], %s891_s22 }
  0x45   : > { %v435_v2 = vld [vmem:[%s357_s26] sm:$0xff]  ;;  %v867_v6 = vld [vmem:[%s1426_s8 + $0x20] sm:$0xff]  ;;  %s1440_s10 = scalar_lea.vmem [#allocation11], %s863_s24  ;;  %v1234_v20 = vmov 683565275   ;;  %s1591_s30 = sld [smem:[#allocation18_spill]] }
  0x46   : > { %v1433_v3 = vmul.f32 %v435_v2, %v433_v0  ;;  %v636_v4 = vmul.f32 %v435_v2, %v434_v1  ;;  %v871_v7 = vld [vmem:[%s1437_s9 + $0x20] sm:$0xff]  ;;  %v1235_v22 = vmov 2475754826   ;;  %v1236_v24 = vmov 2131351028   ;;  %s1593_s27 = sld [smem:[#allocation28_spill]] }
  0x47   : > { %v1445_v8 = vsub.f32 %v871_v7, %v867_v6  ;;  %v1237_v26 = vmov 2102212464   ;;  %v1238_v28 = vmov 920167782   ;;  %v1239_v34 = vmov 1326507024  }
  0x48   : > { %v635_v5 = vmul.f32 %v1433_v3, %v434_v1  ;;  %876 = vst [vmem:[%s1440_s10 + $0x8] sm:$0xff] %v1433_v3  ;;  %s670_s13 = sshll.u32 %s1440_s10, 4  ;;  %s658_s17 = scalar_lea.sflag [#allocation4], %s1412_s3  ;;  %s671_s13 = int_to_ptr.vmem [resolvable:$true] %s670_s13 }
  0x49   : > { %878 = vst [vmem:[%s1440_s10 + $0x10] sm:$0xff] %v636_v4  ;;  %v481_v9 = vand.u32 2139095040, %v1445_v8  ;;  %v478_v11 = vand.u32 2147483647, %v1445_v8  ;;  %vm480_vm12 = vcmp.lt.s32.totalorder %v1445_v8, 0 }
  0x4a   : > { %641 = vst [vmem:[%s1440_s10] sm:$0xff] %v635_v5 }
  0x4b   : > { %v482_v10 = vshrl.u32 %v481_v9, 23  ;;  %v485_v14 = vand.u32 8388607, %v478_v11  ;;  %vm1498_vm13 = vcmp.le.f32.partialorder %v478_v11, 0.7853982  ;;  %s886_s11 = sshll.u32 %s1591_s30, 5 }
  0x4c   : > { %s669_s7 = scalar_lea.hbm %s1593_s27, %s886_s11  ;;  %s1160_s5 = scalar_lea.hbm %s1593_s27, 64 }
  0x4d   : > { %v872_v12 = vadd.s32 4294967169, %v482_v10  ;;  %v486_v18 = vor.u32 8388608, %v485_v14  ;;  %v1240_v10 = vmov 0   ;;  %s672_s16 = sshll.u32 %s669_s7, 4  ;;  %s673_s16 = int_to_ptr.hbm [resolvable:$true] %s672_s16 }
  0x4e   : > { %s1154_s28 = sshra.s32 %s673_s16, 4  ;;  %s1155_s28 = int_to_ptr.hbm [resolvable:$true] %s1154_s28 }
  0x4f   : > { %v488_v13 = vadd.s32 1, %v872_v12  ;;  %v1456_v38 = vshll.u32 %v486_v18, 8  ;;  %s1156_s15 = scalar_lea.hbm %s1155_s28, 32  ;;  %p1161_p7 = scmp.lt.s32.totalorder %s1155_s28, %s1593_s27 }
  0x50   : > { %p1157_p4 = scmp.ne.s32.totalorder %s1155_s28, %s1156_s15  ;;  %p1162_p8 = scmp.lt.s32.totalorder %s1160_s5, %s1156_s15 }
  0x51   : > { %vm489_vm0 = vcmp.gt.s32.totalorder %v488_v13, 0  ;;  %v527_v48 = vand.u32 65535, %v1456_v38  ;;  %v528_v49 = vshrl.u32 %v1456_v38, 16 }
  0x52   : > { %v490_v15 = vsel %vm489_vm0, %v488_v13, 0  ;;  %p1158_p5 = pnand %p1157_p4, %p1328_p9  ;;  %p1163_p10 = por %p1162_p8, %p1161_p7 }
  0x53   : > { %v492_v16 = vand.u32 31, %v490_v15  ;;  %v1452_v17 = vshrl.u32 %v490_v15, 5 }
  0x54   : > { %p1159_p6 = pneg %p1158_p5 }
  0x55   : > { %v493_v19 = vsub.s32 32, %v492_v16  ;;  %v495_v21 = vshll.u32 %v1234_v20, %v492_v16  ;;  %v498_v23 = vshll.u32 %v1235_v22, %v492_v16  ;;  %v501_v25 = vshll.u32 %v1236_v24, %v492_v16 }
  0x56   : > { %v504_v27 = vshll.u32 %v1237_v26, %v492_v16  ;;  %v507_v29 = vshll.u32 %v1238_v28, %v492_v16  ;;  %vm510_vm1 = vcmp.lt.s32.totalorder %v1452_v17, 1  ;;  %vm512_vm2 = vcmp.lt.s32.totalorder %v1452_v17, 3  ;;  %p1164_p13 = pnand %p1163_p10, %p1159_p6 }
  0x57   : > { %v496_v30 = vshrl.u32 %v1235_v22, %v493_v19  ;;  %v499_v31 = vshrl.u32 %v1236_v24, %v493_v19  ;;  %v502_v32 = vshrl.u32 %v1237_v26, %v493_v19  ;;  %v505_v33 = vshrl.u32 %v1238_v28, %v493_v19 }
  0x58   : > { %v508_v35 = vshrl.u32 %v1239_v34, %v493_v19  ;;  %vm513_vm3 = vcmp.lt.s32.totalorder %v1452_v17, 4  ;;  %vm511_vm4 = vcmp.lt.s32.totalorder %v1452_v17, 2  ;;  %v494_v56 = vshrl.u32 %v1234_v20, %v493_v19 }
  0x59   : > { %v497_v36 = vor.u32 %v496_v30, %v495_v21  ;;  %v500_v37 = vor.u32 %v499_v31, %v498_v23  ;;  %v503_v39 = vor.u32 %v502_v32, %v501_v25  ;;  %v506_v40 = vor.u32 %v505_v33, %v504_v27 }
  0x5a   : > { %v509_v41 = vor.u32 %v508_v35, %v507_v29 }
  0x5b   : > { %v518_v42 = vsel %vm510_vm1, %v497_v36, %v500_v37  ;;  %v519_v43 = vsel %vm513_vm3, %v506_v40, 920167782  ;;  %v522_v44 = vsel %vm510_vm1, %v500_v37, %v503_v39  ;;  %v514_v6 = vsel %vm510_vm1, %v494_v56, %v497_v36 }
  0x5c   : > { %v523_v45 = vsel %vm513_vm3, %v509_v41, 1326507024  ;;  %v520_v46 = vsel %vm512_vm2, %v503_v39, %v519_v43  ;;  %v515_v9 = vsel %vm513_vm3, %v503_v39, 2102212464  ;;  %vm621_vm1 = vweird.f32 %v1445_v8 }
  0x5d   : > { %v524_v47 = vsel %vm512_vm2, %v506_v40, %v523_v45  ;;  %v521_v50 = vsel %vm511_vm4, %v518_v42, %v520_v46  ;;  %v516_v21 = vsel %vm512_vm2, %v500_v37, %v515_v9  ;;  %v864_v45 = vld [vmem:[%s1426_s8 + $0x8] sm:$0xff] }
  0x5e   : > { %v525_v51 = vsel %vm511_vm4, %v522_v44, %v524_v47  ;;  %v551_v54 = vand.u32 65535, %v521_v50  ;;  %v552_v55 = vshrl.u32 %v521_v50, 16  ;;  %v517_v29 = vsel %vm511_vm4, %v514_v6, %v516_v21  ;;  %v865_v47 = vld [vmem:[%s1426_s8 + $0x10] sm:$0xff] }
  0x5f   : > { %v529_v52 = vand.u32 65535, %v525_v51  ;;  %v530_v53 = vshrl.u32 %v525_v51, 16  ;;  %v571_v33 = vmul.u32 %v1456_v38, %v517_v29  ;;  %v437_v38 = vld [vmem:[%s1426_s8] sm:$0xff]  ;;  %v868_v51 = vld [vmem:[%s1437_s9 + $0x8] sm:$0xff] }
  0x60   : > { %v553_v60 = vmul.u32 %v551_v54, %v527_v48  ;;  %v554_v61 = vmul.u32 %v552_v55, %v527_v48  ;;  %v555_v62 = vmul.u32 %v551_v54, %v528_v49  ;;  %v556_v2 = vmul.u32 %v552_v55, %v528_v49 }
  0x61   : > { %v531_v57 = vmul.u32 %v529_v52, %v527_v48  ;;  %v532_v58 = vmul.u32 %v530_v53, %v527_v48  ;;  %v533_v59 = vmul.u32 %v529_v52, %v528_v49  ;;  %v534_v63 = vmul.u32 %v530_v53, %v528_v49  ;;  %v866_v48 = vld [vmem:[%s1426_s8 + $0x18] sm:$0xff]  ;;  %v446_v49 = vld [vmem:[%s1437_s9] sm:$0xff]  ;;  %v869_v52 = vld [vmem:[%s1437_s9 + $0x10] sm:$0xff] }
  0x62   : > { %v557_v4 = vshll.u32 %v554_v61, 16  ;;  %v559_v5 = vshll.u32 %v555_v62, 16  ;;  %v558_v19 = vshrl.u32 %v554_v61, 16  ;;  %v560_v25 = vshrl.u32 %v555_v62, 16  ;;  %v870_v53 = vld [vmem:[%s1437_s9 + $0x18] sm:$0xff] }
  0x63   : > { %v535_v0 = vshll.u32 %v532_v58, 16  ;;  %v537_v1 = vshll.u32 %v533_v59, 16  ;;  %v536_v14 = vshrl.u32 %v532_v58, 16  ;;  %v538_v22 = vshrl.u32 %v533_v59, 16 }
  0x64   : > { %vm561_vm6 = vc.u32 %v553_v60, %v557_v4  ;;  %v563_v13 = vadd.s32 %v557_v4, %v553_v60  ;;  %v456_v58 = vadd.f32 %v866_v48, %v864_v45  ;;  %v458_v61 = vadd.f32 %v869_v52, %v446_v49 }
  0x65   : > { %vm539_vm5 = vc.u32 %v531_v57, %v535_v0  ;;  %v541_v7 = vadd.s32 %v535_v0, %v531_v57  ;;  %v562_v16 = vsel %vm561_vm6, 1, %v1240_v10  ;;  %v455_v57 = vadd.f32 %v865_v47, %v437_v38 }
  0x66   : > { %v540_v12 = vsel %vm539_vm5, 1, %v1240_v10  ;;  %v564_v20 = vadd.s32 %v562_v16, %v556_v2  ;;  %vm565_vm8 = vc.u32 %v563_v13, %v559_v5  ;;  %v567_v28 = vadd.s32 %v563_v13, %v559_v5 }
  0x67   : > { %v542_v15 = vadd.s32 %v540_v12, %v534_v63  ;;  %vm543_vm7 = vc.u32 %v541_v7, %v537_v1  ;;  %v566_v24 = vsel %vm565_vm8, 1, %v1240_v10  ;;  %v459_v62 = vadd.f32 %v870_v53, %v868_v51 }
  0x68   : > { %v544_v18 = vsel %vm543_vm7, 1, %v1240_v10  ;;  %v568_v26 = vadd.s32 %v566_v24, %v564_v20  ;;  %v461_v63 = vmin.f32 %v864_v45, %v868_v51  ;;  %v462_v0 = vmin.f32 %v866_v48, %v870_v53 }
  0x69   : > { %v546_v23 = vadd.s32 %v544_v18, %v542_v15  ;;  %v464_v1 = vmin.f32 %v437_v38, %v446_v49  ;;  %v465_v2 = vmin.f32 %v865_v47, %v869_v52  ;;  %v457_v9 = vmul.f32 %v456_v58, %v455_v57 }
  0x6a   : > { %v569_v30 = vadd.s32 %v568_v26, %v558_v19  ;;  %v460_v10 = vmul.f32 %v459_v62, %v458_v61  ;;  %v463_v12 = vadd.f32 %v462_v0, %v461_v63 }
  0x6b   : > { %v547_v27 = vadd.s32 %v546_v23, %v536_v14  ;;  %v466_v13 = vadd.f32 %v465_v2, %v464_v1 }
  0x6c   : > { %v570_v32 = vadd.s32 %v569_v30, %v560_v25  ;;  %v468_v18 = vadd.f32 %v460_v10, %v457_v9 }
  0x6d   : > { %v548_v31 = vadd.s32 %v547_v27, %v538_v22  ;;  %v467_v16 = vmul.f32 %v466_v13, %v463_v12 }
  0x6e   : > { %v574_v34 = vadd.s32 1, %v570_v32 }
  0x6f   : > { %vm573_vm9 = vc.u32 %v548_v31, %v567_v28  ;;  %v572_v46 = vadd.s32 %v567_v28, %v548_v31  ;;  %v469_v24 = vsub.f32 %v468_v18, %v467_v16  ;;  %v473_v28 = vadd.f32 1.0, %v467_v16 }
  0x70   : > { %v575_v35 = vsel %vm573_vm9, %v574_v34, %v570_v32 }
  0x71   : > { %v576_v36 = vadd.s32 %v575_v35, %v571_v33  ;;  %v470_v30 = vadd.f32 1.0, %v469_v24  ;;  %986 = vlog2.f32 %v473_v28 }
  0x73   : > { %v577_v37 = vadd.s32 536870912, %v576_v36  ;;  %988 = vlog2.f32 %v470_v30 }
  0x75   : > { %v578_v39 = vshrl.u32 %v577_v37, 30 }
  0x77   : > { %v579_v40 = vshll.u32 %v578_v39, 30  ;;  %v602_v22 = vsub.s32 4, %v578_v39 }
  0x79   : > { %v580_v17 = vsub.s32 %v576_v36, %v579_v40  ;;  %v603_v29 = vsel %vm480_vm12, %v602_v22, %v578_v39 }
  0x7a   : > { %v605_v11 = vsel %vm1498_vm13, 0, %v603_v29 }
  0x7b   : > { %vm581_vm10 = vcmp.lt.s32.totalorder %v580_v17, 0  ;;  %v582_v41 = vsub.s32 0, %v580_v17  ;;  %v622_v37 = vand.u32 3, %v605_v11 }
  0x7d   : > { %v583_v42 = vsel %vm581_vm10, %v582_v41, %v580_v17  ;;  %vm627_vm14 = vcmp.eq.s32.totalorder %v622_v37, 2  ;;  %vm624_vm15 = vcmp.eq.s32.totalorder %v622_v37, 0  ;;  %vm623_vm0 = vcmp.lt.s32.totalorder %v622_v37, 2 }
  0x7e   : > { %v584_v43 = vclz %v583_v42 }
  0x80   : > { %v873_v44 = vadd.s32 4294967294, %v584_v43  ;;  %v987_v43 = vpop.eup %986 }
  0x81   : > { %v989_v39 = vpop.eup %988  ;;  %v475_v48 = vmul.f32 0.6931472, %v987_v43 }
  0x82   : > { %vm874_vm11 = vcmp.lt.s32.totalorder %v873_v44, 0  ;;  %v472_v47 = vmul.f32 0.6931472, %v989_v39 }
  0x83   : > { %v587_v50 = vsel %vm874_vm11, 0, %v873_v44 }
  0x84   : > { %v588_v54 = vsub.s32 32, %v587_v50  ;;  %v589_v55 = vshll.u32 %v580_v17, %v587_v50  ;;  %v592_v56 = vsub.s32 4294967266, %v587_v50  ;;  %v476_v52 = vsub.f32 %v472_v47, %v475_v48 }
  0x86   : > { %v590_v59 = vshrl.u32 %v572_v46, %v588_v54  ;;  %v593_v60 = vadd.s32 127, %v592_v56 }
  0x88   : > { %v591_v4 = vor.u32 %v590_v59, %v589_v55  ;;  %v594_v5 = vshll.u32 %v593_v60, 23 }
  0x8a   : > { %v595_v6 = vor.u32 4788187, %v594_v5  ;;  %v598_v7 = vcvt.s32.f32 %v591_v4 }
  0x8c   : > { %v596_v14 = vand.u32 2147483647, %v595_v6 }
  0x8e   : > { %v599_v15 = vmul.f32 %v598_v7, %v596_v14 }
  0x90   : > { %v600_v20 = vxor.u32 2147483648, %v599_v15 }
  0x92   : > { %v601_v21 = vsel %vm480_vm12, %v600_v20, %v599_v15 }
  0x93   : > { %v604_v23 = vsel %vm1498_vm13, %v1445_v8, %v601_v21 }
  0x94   : > { %v606_v25 = vmul.f32 %v604_v23, %v604_v23 }
  0x96   : > { %v607_v26 = vmul.f32 -0.001358992, %v606_v25  ;;  %v614_v27 = vmul.f32 -0.00019511016, %v606_v25 }
  0x98   : > { %v608_v31 = vadd.f32 0.041655596, %v607_v26  ;;  %v615_v32 = vadd.f32 0.008332121, %v614_v27 }
  0x9a   : > { %v609_v33 = vmul.f32 %v608_v31, %v606_v25  ;;  %v616_v34 = vmul.f32 %v615_v32, %v606_v25 }
  0x9c   : > { %v610_v35 = vadd.f32 -0.4999988, %v609_v33  ;;  %v617_v36 = vadd.f32 -0.16666654, %v616_v34 }
  0x9e   : > { %v611_v40 = vmul.f32 %v610_v35, %v606_v25  ;;  %v618_v17 = vmul.f32 %v617_v36, %v606_v25 }
  0xa0   : > { %v612_v41 = vadd.f32 1.0, %v611_v40  ;;  %v619_v42 = vadd.f32 1.0, %v618_v17 }
  0xa2   : > { %v620_v44 = vmul.f32 %v619_v42, %v604_v23  ;;  %v628_v38 = vxor.u32 2147483648, %v612_v41 }
  0xa4   : > { %v625_v45 = vxor.u32 2147483648, %v620_v44  ;;  %v629_v46 = vsel %vm627_vm14, %v628_v38, %v620_v44 }
  0xa6   : > { %v626_v49 = vsel %vm624_vm15, %v612_v41, %v625_v45 }
  0xa7   : > { %v630_v50 = vsel %vm623_vm0, %v626_v49, %v629_v46 }
  0xa8   : > { %v631_v51 = vsel %vm621_vm1, nan, %v630_v50 }
  0xa9   : > { %v632_v53 = vsub.f32 1.0, %v631_v51 }
  0xab   : > { %v633_v54 = vmul.f32 20.0, %v632_v53 }
  0xad   : > { %v634_v55 = vadd.f32 %v633_v54, %v476_v52 }
  0xaf   : > { %v637_v56 = vmul.f32 %v634_v55, %v1433_v3 }
  0xb1   : > { %880 = vst [vmem:[%s1440_s10 + $0x18] sm:$0xff] %v637_v56 }
  0xb2   : > { %1167 = shalt.err (!%p1164_p13)
}
  0xb3   : > { %s1241_s3 = smov 128   ;;  %s1242_s0 = smov 8  }
  0xb4   : > { %902 = dma.vmem_to_hbm [thread:$0]  (%p1328_p9), %s671_s13, 512, %s673_s16, %s658_s17, %s1241_s3, %s1241_s3, %s1242_s0  }
  0xb5 PF: > { %s1594_s20 = sld [smem:[#allocation16_spill]]  ;;  %p921_p0 = pnand %p850_p12, %p1335_p11 }
  0xb6   : > { %s1596_s22 = sld [smem:[#allocation20_spill]] }
  0xb7   : > { %p922_p1 = pneg %p921_p0 }
  0xbb   : > { %s687_s26 = sand.u32 1, %s1594_s20  }
  0xbc   : > { %s688_s6 = scalar_lea.sflag [#allocation4], %s687_s26 }
  0xbd   : > { %1205 = dma.done.wait (%p922_p1), %s688_s6, 512  }
  0xbe   : > { %1207 = vsyncadd (%p922_p1), %s688_s6, 4294966784  ;;  %s27_s23 = sadd.s32 1, %s1596_s22   ;;  %s1597_s8 = sld [smem:[#allocation17_spill]] }
  0xbf   : > { %p24_p2 = scmp.ge.s32.totalorder %s27_s23, 4   ;;  %s1598_s20 = sld [smem:[#allocation23_spill]] }
  0xc0   : > { %s1599_s21 = sld [smem:[#allocation19_spill]]  ;;  %s1601_s18 = smov %s1214_s19 }
  0xc1   : > { %s1600_s22 = sld [smem:[#allocation21_spill]]  ;;  %26 = sbr.rel (!%p24_p2) target bundleno = 15 (0xf), region = 148 }
  0xc4   : > { %s1602_s19 = smov %s1597_s8 }
  0xc6   :  { %694 = vsyncpa [#allocation3], 1 }
  0xc7   :  { %696 = vsyncpa [#allocation3 + $0x1], 1 }
  0xc8   :  { %697 = vsyncpa [#allocation6], 1 }
  0xc9   :  { %699 = vsyncpa [#allocation6 + $0x1], 1 }
  0xca   :  { %700 = vsyncpa [#allocation9], 1 }
  0xcb   :  { %702 = vsyncpa [#allocation9 + $0x1], 1 }
  0xcc   :  { %703 = vsyncpa [#allocation4], 1 }
  0xcd   :  { %705 = vsyncpa [#allocation4 + $0x1], 1 }

</bundles_post_ra>
